<compile_context>
chip_gen: v5e
topology: v5e:2x2
jax: 0.10.0
libtpu: 0.0.40
codegen_flags: <defaults>
</compile_context>

<pallas_src>
import jax
import jax.numpy as jnp
from jax.experimental import pallas as pl
from jax.experimental.pallas import tpu as pltpu

N_EMBD = 32
HIDDEN = 4 * N_EMBD          # 128
DROPOUT = 0.2                # unused: eval-mode forward (identity)
PACK = 4                     # tokens packed per lane-dense row (4 * 32 = 128 lanes)
TM_PACKED = 512              # packed-row tile cap => 2048 tokens per grid step


def _round_up(x, m):
    return ((x + m - 1) // m) * m


def _block_diag(w, reps):
    """(a, b) -> (reps*a, reps*b) block-diagonal replication of w."""
    a, b = w.shape
    eye = jnp.eye(reps, dtype=w.dtype)
    return (eye[:, None, :, None] * w[None, :, None, :]).reshape(reps * a, reps * b)


def ffn_kernel(x_ref, w1_ref, b1_ref, w2_ref, b2_ref, o_ref):
    # x_ref : (tm, PACK*N_EMBD)           f32/bf16 -- 4 tokens packed per row
    # w1_ref: (PACK*N_EMBD, PACK*HIDDEN)  bf16 block-diagonal
    # b1_ref: (1, PACK*HIDDEN)            f32
    # w2_ref: (PACK*HIDDEN, PACK*N_EMBD)  bf16 block-diagonal
    # b2_ref: (1, PACK*N_EMBD)            f32
    # o_ref : (tm, PACK*N_EMBD)           same dtype as x
    x = x_ref[...].astype(jnp.bfloat16)
    h = jnp.dot(x, w1_ref[...], preferred_element_type=jnp.float32) + b1_ref[...]
    h = jnp.maximum(h, 0.0)                                   # ReLU (f32)
    y = jnp.dot(h.astype(jnp.bfloat16), w2_ref[...],
                preferred_element_type=jnp.float32) + b2_ref[...]
    o_ref[...] = y.astype(o_ref.dtype)


def prepare_ffn_params(w1, b1, w2, b2):
    """Build the block-diagonal bf16 weights ONCE; reuse across calls."""
    w1_bd = _block_diag(w1, PACK).astype(jnp.bfloat16)        # (128, 512)
    w2_bd = _block_diag(w2, PACK).astype(jnp.bfloat16)        # (512, 128)
    b1_t = jnp.tile(b1, PACK).reshape(1, PACK * HIDDEN).astype(jnp.float32)
    b2_t = jnp.tile(b2, PACK).reshape(1, PACK * N_EMBD).astype(jnp.float32)
    return w1_bd, b1_t, w2_bd, b2_t


def _choose_tm(packed_rows, tm_cap):
    """Largest multiple of 8 <= tm_cap that still gives a >=2-step grid."""
    if packed_rows <= 8:
        return packed_rows                      # too small for a 2-step grid
    half = (packed_rows // 2) // 8 * 8
    return max(8, min(tm_cap, half))


def feed_forward(x, params, *, tm_packed=TM_PACKED):
    """x: (B, T, n_embd); params from prepare_ffn_params (stored (in, out))."""
    w1_bd, b1_t, w2_bd, b2_t = params
    B, T, C = x.shape
    assert C == N_EMBD
    rows = B * T

    # --- lane-dense packing; pad only to a multiple of PACK*8 = 32 tokens ----
    padded_rows = _round_up(rows, PACK * 8)
    packed_rows = padded_rows // PACK                       # multiple of 8

    x2d = x.reshape(rows, C)
    if padded_rows != rows:
        x2d = jnp.pad(x2d, ((0, padded_rows - rows), (0, 0)))
    xp = x2d.reshape(packed_rows, PACK * C)                 # row-major identity

    tm = _choose_tm(packed_rows, tm_packed)
    grid = (pl.cdiv(packed_rows, tm),)                      # ragged last block OK

    resident = pl.Buffered(buffer_count=1)                  # weights never re-DMA'd
    out_p = pl.pallas_call(
        ffn_kernel,
        out_shape=jax.ShapeDtypeStruct((packed_rows, PACK * C), x.dtype),
        grid_spec=pltpu.PrefetchScalarGridSpec(
            num_scalar_prefetch=0,
            grid=grid,
            in_specs=[
                pl.BlockSpec((tm, PACK * C), lambda i: (i, 0)),
                pl.BlockSpec((PACK * C, PACK * HIDDEN), lambda i: (0, 0),
                             pipeline_mode=resident),
                pl.BlockSpec((1, PACK * HIDDEN), lambda i: (0, 0),
                             pipeline_mode=resident),
                pl.BlockSpec((PACK * HIDDEN, PACK * C), lambda i: (0, 0),
                             pipeline_mode=resident),
                pl.BlockSpec((1, PACK * C), lambda i: (0, 0),
                             pipeline_mode=resident),
            ],
            out_specs=pl.BlockSpec((tm, PACK * C), lambda i: (i, 0)),
        ),
        compiler_params=pltpu.CompilerParams(
            dimension_semantics=("parallel",)),
    )(xp, w1_bd, b1_t, w2_bd, b2_t)

    out2d = out_p.reshape(padded_rows, C)
    if padded_rows != rows:
        out2d = out2d[:rows]                                # drop pad rows
    return out2d.reshape(B, T, C)


def init_params(key):
    """PyTorch nn.Linear default init: U(-1/sqrt(fan_in), 1/sqrt(fan_in))."""
    k1, k2, k3, k4 = jax.random.split(key, 4)
    bound1 = 1.0 / (N_EMBD ** 0.5)
    bound2 = 1.0 / (HIDDEN ** 0.5)
    w1 = jax.random.uniform(k1, (N_EMBD, HIDDEN), jnp.float32, -bound1, bound1)
    b1 = jax.random.uniform(k2, (HIDDEN,), jnp.float32, -bound1, bound1)
    w2 = jax.random.uniform(k3, (HIDDEN, N_EMBD), jnp.float32, -bound2, bound2)
    b2 = jax.random.uniform(k4, (N_EMBD,), jnp.float32, -bound2, bound2)
    return w1, b1, w2, b2


if __name__ == "__main__":
    key = jax.random.PRNGKey(0)
    k_x, k_p, k_x2 = jax.random.split(key, 3)

    w1, b1, w2, b2 = init_params(k_p)
    params = prepare_ffn_params(w1, b1, w2, b2)          # built once, reused
    ffn = jax.jit(feed_forward)

    def ref_fn(xx):
        r = jnp.maximum(xx.reshape(-1, N_EMBD) @ w1 + b1, 0.0) @ w2 + b2
        return r.reshape(xx.shape)

    # Small shape from the module spec (batch=2, seq=8, n_embd=32).
    B, T = 2, 8
    x = jax.random.normal(k_x, (B, T, N_EMBD), dtype=jnp.float32)
    out = jax.block_until_ready(ffn(x, params))
    assert out.shape == (B, T, N_EMBD)
    # bf16 MXU inputs (f32 accumulation) => loosened tolerance vs f32 reference.
    assert jnp.allclose(out, ref_fn(x), atol=2e-2, rtol=2e-2), \
        float(jnp.max(jnp.abs(out - ref_fn(x))))

    # Larger, ragged case: exercises the multi-step grid + masked last block.
    B2, T2 = 4, 67
    x2 = jax.random.normal(k_x2, (B2, T2, N_EMBD), dtype=jnp.float32)
    out2 = jax.block_until_ready(ffn(x2, params))
    assert out2.shape == (B2, T2, N_EMBD)
    assert jnp.allclose(out2, ref_fn(x2), atol=2e-2, rtol=2e-2), \
        float(jnp.max(jnp.abs(out2 - ref_fn(x2))))

    print("KERNEL_OK")
</pallas_src>

<mosaic_0001>
module attributes {stable_mosaic.version = 11 : i64} {
  func.func @ffn_kernel(%arg0: i32, %arg1: memref<8x128xf32, #tpu.memory_space<vmem>>, %arg2: memref<128x512xbf16, #tpu.memory_space<vmem>>, %arg3: memref<1x512xf32, #tpu.memory_space<vmem>>, %arg4: memref<512x128xbf16, #tpu.memory_space<vmem>>, %arg5: memref<1x128xf32, #tpu.memory_space<vmem>>, %arg6: memref<8x128xf32, #tpu.memory_space<vmem>>) attributes {dimension_semantics = [#tpu.dimension_semantics<parallel>], iteration_bounds = array<i64: 1>, scalar_prefetch = 0 : i64, scratch_operands = 0 : i64, tpu.core_type = #tpu.core_type<tc>, window_params = [{transform_indices = @transform_0, window_bounds = array<i64: 8, 128>}, {pipeline_mode = #tpu.pipeline_mode<synchronous>, transform_indices = @transform_1, window_bounds = array<i64: 128, 512>}, {pipeline_mode = #tpu.pipeline_mode<synchronous>, transform_indices = @transform_2, window_bounds = array<i64: 1, 512>}, {pipeline_mode = #tpu.pipeline_mode<synchronous>, transform_indices = @transform_3, window_bounds = array<i64: 512, 128>}, {pipeline_mode = #tpu.pipeline_mode<synchronous>, transform_indices = @transform_4, window_bounds = array<i64: 1, 128>}, {transform_indices = @transform_5, window_bounds = array<i64: 8, 128>}]} {
    %c0 = arith.constant 0 : index
    %c0_0 = arith.constant 0 : index
    %0 = vector.load %arg1[%c0, %c0_0] : memref<8x128xf32, #tpu.memory_space<vmem>>, vector<8x128xf32>
    %1 = arith.truncf %0 : vector<8x128xf32> to vector<8x128xbf16>
    %c0_1 = arith.constant 0 : index
    %c0_2 = arith.constant 0 : index
    %2 = vector.load %arg2[%c0_1, %c0_2] : memref<128x512xbf16, #tpu.memory_space<vmem>>, vector<128x512xbf16>
    %cst = arith.constant dense<0.000000e+00> : vector<8x512xf32>
    %3 = tpu.matmul %1, %2, %cst {dimension_numbers = #tpu.dot_dimension_numbers<[1], [0], [0], [1], [0, 0, 1, 1], [], []>} : vector<8x128xbf16>, vector<128x512xbf16>, vector<8x512xf32> -> vector<8x512xf32>
    %c0_3 = arith.constant 0 : index
    %c0_4 = arith.constant 0 : index
    %4 = vector.load %arg3[%c0_3, %c0_4] : memref<1x512xf32, #tpu.memory_space<vmem>>, vector<1x512xf32>
    %5 = vector.broadcast %4 : vector<1x512xf32> to vector<8x512xf32>
    %6 = arith.addf %3, %5 : vector<8x512xf32>
    %cst_5 = arith.constant 0.000000e+00 : f32
    %7 = vector.broadcast %cst_5 : f32 to vector<8x512xf32>
    %8 = arith.maximumf %6, %7 : vector<8x512xf32>
    %9 = arith.truncf %8 : vector<8x512xf32> to vector<8x512xbf16>
    %c0_6 = arith.constant 0 : index
    %c0_7 = arith.constant 0 : index
    %10 = vector.load %arg4[%c0_6, %c0_7] : memref<512x128xbf16, #tpu.memory_space<vmem>>, vector<512x128xbf16>
    %cst_8 = arith.constant dense<0.000000e+00> : vector<8x128xf32>
    %11 = tpu.matmul %9, %10, %cst_8 {dimension_numbers = #tpu.dot_dimension_numbers<[1], [0], [0], [1], [0, 0, 1, 1], [], []>} : vector<8x512xbf16>, vector<512x128xbf16>, vector<8x128xf32> -> vector<8x128xf32>
    %c0_9 = arith.constant 0 : index
    %c0_10 = arith.constant 0 : index
    %12 = vector.load %arg5[%c0_9, %c0_10] : memref<1x128xf32, #tpu.memory_space<vmem>>, vector<1x128xf32>
    %13 = vector.broadcast %12 : vector<1x128xf32> to vector<8x128xf32>
    %14 = arith.addf %11, %13 : vector<8x128xf32>
    %c0_11 = arith.constant 0 : index
    %c0_12 = arith.constant 0 : index
    %15 = vector.load %arg6[%c0_11, %c0_12] : memref<8x128xf32, #tpu.memory_space<vmem>>, vector<8x128xf32>
    tpu.vector_store %arg6[%c0_11, %c0_12], %14 {strides = array<i32>} : memref<8x128xf32, #tpu.memory_space<vmem>>, vector<8x128xf32>,
    return
  }
  func.func @transform_0(%arg0: i32) -> (i32, i32) {
    %c0_i32 = arith.constant 0 : i32
    %c0_i32_0 = arith.constant 0 : i32
    return %arg0, %c0_i32 : i32, i32
  }
  func.func @transform_1(%arg0: i32) -> (i32, i32) {
    %c0_i32 = arith.constant 0 : i32
    %c0_i32_0 = arith.constant 0 : i32
    %c0_i32_1 = arith.constant 0 : i32
    return %c0_i32, %c0_i32_0 : i32, i32
  }
  func.func @transform_2(%arg0: i32) -> (i32, i32) {
    %c0_i32 = arith.constant 0 : i32
    %c0_i32_0 = arith.constant 0 : i32
    %c0_i32_1 = arith.constant 0 : i32
    return %c0_i32, %c0_i32_0 : i32, i32
  }
  func.func @transform_3(%arg0: i32) -> (i32, i32) {
    %c0_i32 = arith.constant 0 : i32
    %c0_i32_0 = arith.constant 0 : i32
    %c0_i32_1 = arith.constant 0 : i32
    return %c0_i32, %c0_i32_0 : i32, i32
  }
  func.func @transform_4(%arg0: i32) -> (i32, i32) {
    %c0_i32 = arith.constant 0 : i32
    %c0_i32_0 = arith.constant 0 : i32
    %c0_i32_1 = arith.constant 0 : i32
    return %c0_i32, %c0_i32_0 : i32, i32
  }
  func.func @transform_5(%arg0: i32) -> (i32, i32) {
    %c0_i32 = arith.constant 0 : i32
    %c0_i32_0 = arith.constant 0 : i32
    return %arg0, %c0_i32 : i32, i32
  }
}

</mosaic_0001>

<bundles_post_ra>
// kernel: feed_forward.1
= control target key start
LH: loop header
LB: loop body
LE: loop exit
PB: predicated region body
PF: predicated region fallthrough
CT: control target
= control target key end

     0   :  { %10 = vsyncpa [#allocation3], 0  ;;  %s1068_s0 = inlined_call_operand.vmem [shape: f32[8,128], index: 0, kind: input, shape index: {}]   ;;  %s1069_s1 = inlined_call_operand.hbm [shape: bf16[128,512], index: 1, kind: input, shape index: {}]   ;;  %s1070_s2 = inlined_call_operand.vmem [shape: f32[1,512], index: 2, kind: input, shape index: {}]   ;;  %s1071_s3 = inlined_call_operand.hbm [shape: bf16[512,128], index: 3, kind: input, shape index: {}]   ;;  %s1072_s4 = inlined_call_operand.vmem [shape: f32[1,128], index: 4, kind: input, shape index: {}]   ;;  %s1073_s5 = inlined_call_operand.vmem [shape: f32[8,128], index: 5, kind: output, shape index: {}]  }
   0x1   :  { %s18_s20 = sshll.u32 %s1069_s1, 4  ;;  %s19_s20 = int_to_ptr.hbm [resolvable:$true] %s18_s20 }
   0x2   :  { %11 = vsyncpa [#allocation5], 0  ;;  %s1014_s21 = smov [#allocation2]   ;;  %s33_s25 = sshll.u32 %s1071_s3, 4  ;;  %s34_s25 = int_to_ptr.hbm [resolvable:$true] %s33_s25 }
   0x3   :  { %s20_s22 = sshll.u32 %s1014_s21, 4  ;;  %s1015_s26 = smov 256   ;;  %s21_s22 = int_to_ptr.vmem [resolvable:$true] %s20_s22 }
   0x4   :  { %s1016_s27 = smov 16   ;;  %s1017_s28 = smov [#allocation4]  }
   0x5   :  { %26 = dma.hbm_to_vmem [thread:$0]  %s19_s20, 4096, %s21_s22, [#allocation3], %s1015_s26, %s1015_s26, %s1016_s27  }
   0x6   :  { %s35_s29 = sshll.u32 %s1017_s28, 4  ;;  %s1018_s30 = smov 64   ;;  %s36_s29 = int_to_ptr.vmem [resolvable:$true] %s35_s29 }
   0x7   :  { %s1019_s6 = smov 4  }
   0x8   :  { %41 = dma.hbm_to_vmem [thread:$0]  %s34_s25, 4096, %s36_s29, [#allocation5], %s1018_s30, %s1018_s30, %s1019_s6  }
   0x9   :  { %1010 = dma.done.wait [#allocation3], 4096  }
   0xa   :  { %1011 = vsyncadd [#allocation3], 4294963200 }
   0xb   :  { %1012 = dma.done.wait [#allocation5], 4096  }
   0xc   :  { %1013 = vsyncadd [#allocation5], 4294963200  ;;  %v757_v0 = vld [vmem:[#allocation2 + $0xe8] sm:$0xf]  ;;  %v922_v1 = vld [vmem:[#allocation2 + $0xf4] sm:$0xf0] }
   0xd   :  { %v920_v2 = vld [vmem:[#allocation2 + $0xec] sm:$0xf]  ;;  %v758_v3 = vor.u32 %v922_v1, %v757_v0  ;;  %v759_v4 = vld [vmem:[#allocation2 + $0xf8] sm:$0xf0]  ;;  %v749_v5 = vld [vmem:[#allocation2 + $0xe0] sm:$0xf] }
   0xe   :  { %v921_v6 = vld [vmem:[#allocation2 + $0xec] sm:$0xf0]  ;;  %v762_v7 = vor.u32 %v920_v2, %v759_v4  ;;  %v919_v9 = vld [vmem:[#allocation2 + $0xe4] sm:$0xf]  ;;  %v751_v10 = vld [vmem:[#allocation2 + $0xf0] sm:$0xf0] }
   0xf   :  { %v750_v8 = vor.u32 %v921_v6, %v749_v5  ;;  %v741_v11 = vld [vmem:[#allocation2 + $0xc8] sm:$0xf]  ;;  %282 = vmatpush.bf16.msra.mxu2 %v758_v3  ;;  %v754_v12 = vor.u32 %v919_v9, %v751_v10  ;;  %v918_v13 = vld [vmem:[#allocation2 + $0xd4] sm:$0xf0]  ;;  %v916_v14 = vld [vmem:[#allocation2 + $0xcc] sm:$0xf] }
  0x10   :  { %v743_v15 = vld [vmem:[#allocation2 + $0xd8] sm:$0xf0]  ;;  %295 = vmatpush.bf16.msra.mxu3 %v762_v7  ;;  %v742_v16 = vor.u32 %v918_v13, %v741_v11  ;;  %v733_v18 = vld [vmem:[#allocation2 + $0xc0] sm:$0xf]  ;;  %v917_v19 = vld [vmem:[#allocation2 + $0xcc] sm:$0xf0] }
  0x11   :  { %256 = vmatpush.bf16.msra.mxu0 %v750_v8  ;;  %v746_v17 = vor.u32 %v916_v14, %v743_v15  ;;  %v915_v20 = vld [vmem:[#allocation2 + $0xc4] sm:$0xf]  ;;  %269 = vmatpush.bf16.msra.mxu1 %v754_v12  ;;  %v734_v21 = vor.u32 %v917_v19, %v733_v18  ;;  %v735_v22 = vld [vmem:[#allocation2 + $0xd0] sm:$0xf0]  ;;  %v725_v23 = vld [vmem:[#allocation2 + $0xa8] sm:$0xf] }
  0x12   :  { %v914_v24 = vld [vmem:[#allocation2 + $0xb4] sm:$0xf0]  ;;  %v738_v25 = vor.u32 %v915_v20, %v735_v22  ;;  %v912_v26 = vld [vmem:[#allocation2 + $0xac] sm:$0xf]  ;;  %v727_v27 = vld [vmem:[#allocation2 + $0xb8] sm:$0xf0] }
  0x13   :  { %v717_v28 = vld [vmem:[#allocation2 + $0xa0] sm:$0xf]  ;;  %283 = vmatpush.bf16.msra.mxu2 %v742_v16  ;;  %v726_v29 = vor.u32 %v914_v24, %v725_v23  ;;  %v913_v30 = vld [vmem:[#allocation2 + $0xac] sm:$0xf0]  ;;  %v911_v31 = vld [vmem:[#allocation2 + $0xa4] sm:$0xf]  ;;  %v730_v33 = vor.u32 %v912_v26, %v727_v27 }
  0x14   :  { %v719_v32 = vld [vmem:[#allocation2 + $0xb0] sm:$0xf0]  ;;  %296 = vmatpush.bf16.msra.mxu3 %v746_v17  ;;  %v718_v34 = vor.u32 %v913_v30, %v717_v28  ;;  %v709_v35 = vld [vmem:[#allocation2 + $0x88] sm:$0xf]  ;;  %v910_v36 = vld [vmem:[#allocation2 + $0x94] sm:$0xf0] }
  0x15   :  { %257 = vmatpush.bf16.msra.mxu0 %v734_v21  ;;  %v908_v37 = vld [vmem:[#allocation2 + $0x8c] sm:$0xf]  ;;  %270 = vmatpush.bf16.msra.mxu1 %v738_v25  ;;  %v722_v38 = vor.u32 %v911_v31, %v719_v32  ;;  %v711_v39 = vld [vmem:[#allocation2 + $0x98] sm:$0xf0]  ;;  %v701_v40 = vld [vmem:[#allocation2 + $0x80] sm:$0xf]  ;;  %v710_v44 = vor.u32 %v910_v36, %v709_v35 }
  0x16   :  { %v909_v41 = vld [vmem:[#allocation2 + $0x8c] sm:$0xf0]  ;;  %v907_v42 = vld [vmem:[#allocation2 + $0x84] sm:$0xf]  ;;  %v703_v43 = vld [vmem:[#allocation2 + $0x90] sm:$0xf0]  ;;  %v714_v45 = vor.u32 %v908_v37, %v711_v39 }
  0x17   :  { %284 = vmatpush.bf16.msra.mxu2 %v726_v29  ;;  %v702_v46 = vor.u32 %v909_v41, %v701_v40  ;;  %v693_v47 = vld [vmem:[#allocation2 + $0x68] sm:$0xf]  ;;  %v906_v48 = vld [vmem:[#allocation2 + $0x74] sm:$0xf0]  ;;  %v904_v49 = vld [vmem:[#allocation2 + $0x6c] sm:$0xf]  ;;  %v706_v50 = vor.u32 %v907_v42, %v703_v43 }
  0x18   :  { %297 = vmatpush.bf16.msra.mxu3 %v730_v33  ;;  %v695_v51 = vld [vmem:[#allocation2 + $0x78] sm:$0xf0]  ;;  %v685_v52 = vld [vmem:[#allocation2 + $0x60] sm:$0xf]  ;;  %v905_v53 = vld [vmem:[#allocation2 + $0x6c] sm:$0xf0]  ;;  %v694_v56 = vor.u32 %v906_v48, %v693_v47 }
  0x19   :  { %258 = vmatpush.bf16.msra.mxu0 %v718_v34  ;;  %271 = vmatpush.bf16.msra.mxu1 %v722_v38  ;;  %v903_v54 = vld [vmem:[#allocation2 + $0x64] sm:$0xf]  ;;  %v687_v55 = vld [vmem:[#allocation2 + $0x70] sm:$0xf0]  ;;  %v698_v57 = vor.u32 %v904_v49, %v695_v51  ;;  %v686_v58 = vor.u32 %v905_v53, %v685_v52  ;;  %v677_v59 = vld [vmem:[#allocation2 + $0x48] sm:$0xf] }
  0x1a   :  { %v902_v60 = vld [vmem:[#allocation2 + $0x54] sm:$0xf0]  ;;  %v900_v61 = vld [vmem:[#allocation2 + $0x4c] sm:$0xf]  ;;  %v690_v62 = vor.u32 %v903_v54, %v687_v55  ;;  %v679_v63 = vld [vmem:[#allocation2 + $0x58] sm:$0xf0] }
  0x1b   :  { %285 = vmatpush.bf16.msra.mxu2 %v710_v44  ;;  %v669_v0 = vld [vmem:[#allocation2 + $0x40] sm:$0xf]  ;;  %v901_v1 = vld [vmem:[#allocation2 + $0x4c] sm:$0xf0]  ;;  %v899_v2 = vld [vmem:[#allocation2 + $0x44] sm:$0xf]  ;;  %v678_v4 = vor.u32 %v902_v60, %v677_v59  ;;  %v682_v5 = vor.u32 %v900_v61, %v679_v63 }
  0x1c   :  { %298 = vmatpush.bf16.msra.mxu3 %v714_v45  ;;  %v671_v3 = vld [vmem:[#allocation2 + $0x50] sm:$0xf0]  ;;  %v670_v6 = vor.u32 %v901_v1, %v669_v0  ;;  %v661_v7 = vld [vmem:[#allocation2 + $0x28] sm:$0xf]  ;;  %v898_v8 = vld [vmem:[#allocation2 + $0x34] sm:$0xf0] }
  0x1d   :  { %259 = vmatpush.bf16.msra.mxu0 %v702_v46  ;;  %272 = vmatpush.bf16.msra.mxu1 %v706_v50  ;;  %v896_v9 = vld [vmem:[#allocation2 + $0x2c] sm:$0xf]  ;;  %v674_v10 = vor.u32 %v899_v2, %v671_v3  ;;  %v663_v11 = vld [vmem:[#allocation2 + $0x38] sm:$0xf0]  ;;  %v653_v12 = vld [vmem:[#allocation2 + $0x20] sm:$0xf]  ;;  %v662_v16 = vor.u32 %v898_v8, %v661_v7 }
  0x1e   :  { %v897_v13 = vld [vmem:[#allocation2 + $0x2c] sm:$0xf0]  ;;  %v895_v14 = vld [vmem:[#allocation2 + $0x24] sm:$0xf]  ;;  %v655_v15 = vld [vmem:[#allocation2 + $0x30] sm:$0xf0]  ;;  %v666_v17 = vor.u32 %v896_v9, %v663_v11 }
  0x1f   :  { %286 = vmatpush.bf16.msra.mxu2 %v694_v56  ;;  %v654_v18 = vor.u32 %v897_v13, %v653_v12  ;;  %v645_v19 = vld [vmem:[#allocation2 + $0x8] sm:$0xf]  ;;  %v894_v20 = vld [vmem:[#allocation2 + $0x14] sm:$0xf0]  ;;  %v892_v21 = vld [vmem:[#allocation2 + $0xc] sm:$0xf]  ;;  %v658_v22 = vor.u32 %v895_v14, %v655_v15 }
  0x20   :  { %299 = vmatpush.bf16.msra.mxu3 %v698_v57  ;;  %v647_v23 = vld [vmem:[#allocation2 + $0x18] sm:$0xf0]  ;;  %v637_v24 = vld [vmem:[#allocation2] sm:$0xf]  ;;  %v893_v25 = vld [vmem:[#allocation2 + $0xc] sm:$0xf0]  ;;  %v646_v28 = vor.u32 %v894_v20, %v645_v19 }
  0x21   :  { %260 = vmatpush.bf16.msra.mxu0 %v686_v58  ;;  %273 = vmatpush.bf16.msra.mxu1 %v690_v62  ;;  %v891_v26 = vld [vmem:[#allocation2 + $0x4] sm:$0xf]  ;;  %v639_v27 = vld [vmem:[#allocation2 + $0x10] sm:$0xf0]  ;;  %v650_v30 = vor.u32 %v892_v21, %v647_v23  ;;  %v638_v31 = vor.u32 %v893_v25, %v637_v24  ;;  %v930_v33 = vld [vmem:[#allocation4 + $0x38] sm:$0xff] }
  0x22   :  { %v52_v29 = vld [vmem:[%s1068_s0] sm:$0xff]  ;;  %v642_v32 = vor.u32 %v891_v26, %v639_v27  ;;  %v938_v35 = vld [vmem:[#allocation4 + $0x78] sm:$0xff]  ;;  %v929_v38 = vld [vmem:[#allocation4 + $0x30] sm:$0xff] }
  0x23   :  { %287 = vmatpush.bf16.msra.mxu2 %v678_v4  ;;  %v53_v34 = vpack.c.bf16 %v52_v29, %v52_v29  ;;  %v946_v36 = vld [vmem:[#allocation4 + $0xb8] sm:$0xff]  ;;  %v937_v39 = vld [vmem:[#allocation4 + $0x70] sm:$0xff]  ;;  %v928_v42 = vld [vmem:[#allocation4 + $0x28] sm:$0xff] }
  0x24   :  { %300 = vmatpush.bf16.msra.mxu3 %v682_v5  ;;  %v954_v37 = vld [vmem:[#allocation4 + $0xf8] sm:$0xff]  ;;  %v945_v40 = vld [vmem:[#allocation4 + $0xb0] sm:$0xff]  ;;  %v936_v43 = vld [vmem:[#allocation4 + $0x68] sm:$0xff] }
  0x25   :  { %261 = vmatpush.bf16.msra.mxu0 %v670_v6  ;;  %274 = vmatpush.bf16.msra.mxu1 %v674_v10  ;;  %v953_v41 = vld [vmem:[#allocation4 + $0xf0] sm:$0xff]  ;;  %v944_v44 = vld [vmem:[#allocation4 + $0xa8] sm:$0xff]  ;;  %v927_v46 = vld [vmem:[#allocation4 + $0x20] sm:$0xff] }
  0x26   :  { %v952_v45 = vld [vmem:[#allocation4 + $0xe8] sm:$0xff]  ;;  %v935_v47 = vld [vmem:[#allocation4 + $0x60] sm:$0xff]  ;;  %v926_v50 = vld [vmem:[#allocation4 + $0x18] sm:$0xff] }
  0x27   :  { %288 = vmatpush.bf16.msra.mxu2 %v662_v16  ;;  %v943_v48 = vld [vmem:[#allocation4 + $0xa0] sm:$0xff]  ;;  %v934_v51 = vld [vmem:[#allocation4 + $0x58] sm:$0xff]  ;;  %v925_v54 = vld [vmem:[#allocation4 + $0x10] sm:$0xff] }
  0x28   :  { %301 = vmatpush.bf16.msra.mxu3 %v666_v17  ;;  %v951_v49 = vld [vmem:[#allocation4 + $0xe0] sm:$0xff]  ;;  %v942_v52 = vld [vmem:[#allocation4 + $0x98] sm:$0xff]  ;;  %v933_v55 = vld [vmem:[#allocation4 + $0x50] sm:$0xff] }
  0x29   :  { %262 = vmatpush.bf16.msra.mxu0 %v654_v18  ;;  %275 = vmatpush.bf16.msra.mxu1 %v658_v22  ;;  %v950_v53 = vld [vmem:[#allocation4 + $0xd8] sm:$0xff]  ;;  %v941_v56 = vld [vmem:[#allocation4 + $0x90] sm:$0xff]  ;;  %v924_v58 = vld [vmem:[#allocation4 + $0x8] sm:$0xff] }
  0x2a   :  { %v949_v57 = vld [vmem:[#allocation4 + $0xd0] sm:$0xff]  ;;  %v932_v59 = vld [vmem:[#allocation4 + $0x48] sm:$0xff]  ;;  %v923_v62 = vld [vmem:[#allocation4] sm:$0xff] }
  0x2b   :  { %289 = vmatpush.bf16.msra.mxu2 %v646_v28  ;;  %v940_v60 = vld [vmem:[#allocation4 + $0x88] sm:$0xff]  ;;  %v931_v63 = vld [vmem:[#allocation4 + $0x40] sm:$0xff] }
  0x2c   :  { %302 = vmatpush.bf16.msra.mxu3 %v650_v30  ;;  %v948_v61 = vld [vmem:[#allocation4 + $0xc8] sm:$0xff]  ;;  %v939_v0 = vld [vmem:[#allocation4 + $0x80] sm:$0xff] }
  0x2d   :  { %263 = vmatpush.bf16.msra.mxu0 %v638_v31  ;;  %276 = vmatpush.bf16.msra.mxu1 %v642_v32  ;;  %v947_v1 = vld [vmem:[#allocation4 + $0xc0] sm:$0xff] }
  0x2e   :  { %290 = vmatmul.bf16.vlgmr.msra.gmra.mxu2 %v53_v34  ;;  %v86_v2 = vld [vmem:[%s1070_s2] sm:$0xf] }
  0x2f   :  { %303 = vmatmul.bf16.vlgmr.msra.gmra.mxu3 %v53_v34  ;;  %602 = vmatpush.bf16.msrb.mxu2 %v946_v36  ;;  %v88_v3 = vperm.slane %v86_v2, 0  ;;  %v89_v4 = vperm.slane %v86_v2, 1  ;;  %v90_v9 = vperm.slane %v86_v2, 2  ;;  %v91_v11 = vperm.slane %v86_v2, 3  ;;  %v961_v27 = vld [vmem:[%s1072_s4] ss:$0 sm:$0xff] }
  0x30   :  { %264 = vmatmul.bf16.vlgmr.msra.gmra.mxu0 %v53_v34  ;;  %277 = vmatmul.bf16.vlgmr.msra.gmra.mxu1 %v53_v34 }
  0x31   :  { %576 = vmatpush.bf16.msrb.mxu0 %v930_v33  ;;  %589 = vmatpush.bf16.msrb.mxu1 %v938_v35 }
  0x32   :  { %615 = vmatpush.bf16.msrb.mxu3 %v954_v37 }
  0x33   :  { %603 = vmatpush.bf16.msrb.mxu2 %v945_v40 }
  0x35   :  { %577 = vmatpush.bf16.msrb.mxu0 %v929_v38  ;;  %590 = vmatpush.bf16.msrb.mxu1 %v937_v39 }
  0x36   :  { %616 = vmatpush.bf16.msrb.mxu3 %v953_v41 }
  0x37   :  { %604 = vmatpush.bf16.msrb.mxu2 %v944_v44 }
  0x39   :  { %578 = vmatpush.bf16.msrb.mxu0 %v928_v42  ;;  %591 = vmatpush.bf16.msrb.mxu1 %v936_v43 }
  0x3a   :  { %617 = vmatpush.bf16.msrb.mxu3 %v952_v45 }
  0x3b   :  { %605 = vmatpush.bf16.msrb.mxu2 %v943_v48 }
  0x3d   :  { %579 = vmatpush.bf16.msrb.mxu0 %v927_v46  ;;  %592 = vmatpush.bf16.msrb.mxu1 %v935_v47 }
  0x3e   :  { %618 = vmatpush.bf16.msrb.mxu3 %v951_v49 }
  0x3f   :  { %606 = vmatpush.bf16.msrb.mxu2 %v942_v52 }
  0x41   :  { %580 = vmatpush.bf16.msrb.mxu0 %v926_v50  ;;  %593 = vmatpush.bf16.msrb.mxu1 %v934_v51 }
  0x42   :  { %619 = vmatpush.bf16.msrb.mxu3 %v950_v53 }
  0x43   :  { %607 = vmatpush.bf16.msrb.mxu2 %v941_v56 }
  0x45   :  { %581 = vmatpush.bf16.msrb.mxu0 %v925_v54  ;;  %594 = vmatpush.bf16.msrb.mxu1 %v933_v55 }
  0x46   :  { %620 = vmatpush.bf16.msrb.mxu3 %v949_v57 }
  0x47   :  { %608 = vmatpush.bf16.msrb.mxu2 %v940_v60 }
  0x49   :  { %582 = vmatpush.bf16.msrb.mxu0 %v924_v58  ;;  %595 = vmatpush.bf16.msrb.mxu1 %v932_v59 }
  0x4a   :  { %621 = vmatpush.bf16.msrb.mxu3 %v948_v61 }
  0x4b   :  { %609 = vmatpush.bf16.msrb.mxu2 %v939_v0 }
  0x4d   :  { %583 = vmatpush.bf16.msrb.mxu0 %v923_v62  ;;  %596 = vmatpush.bf16.msrb.mxu1 %v931_v63 }
  0x4e   :  { %622 = vmatpush.bf16.msrb.mxu3 %v947_v1 }
  0xad   :  { %v265_v5 = vpop.f32.mrf.mxu0  ;;  %v278_v7 = vpop.f32.mrf.mxu1 }
  0xae   :  { %v266_v6 = vadd.f32 %v265_v5, %v88_v3  ;;  %v279_v8 = vadd.f32 %v278_v7, %v89_v4 }
  0xb0   :  { %v308_v10 = vmax.f32 %v266_v6, 0.0  ;;  %v309_v12 = vmax.f32 %v279_v8, 0.0 }
  0xb1   :  { %v291_v14 = vpop.f32.mrf.mxu2 }
  0xb2   :  { %v312_v13 = vpack.c.bf16 %v308_v10, %v308_v10  ;;  %v313_v15 = vpack.c.bf16 %v309_v12, %v309_v12  ;;  %v292_v16 = vadd.f32 %v291_v14, %v90_v9  ;;  %v304_v17 = vpop.f32.mrf.mxu3 }
  0xb3   :  { %v305_v18 = vadd.f32 %v304_v17, %v91_v11 }
  0xb4   :  { %584 = vmatmul.bf16.vlgmr.msrb.gmra.mxu0 %v312_v13  ;;  %v310_v19 = vmax.f32 %v292_v16, 0.0  ;;  %597 = vmatmul.bf16.vlgmr.msrb.gmra.mxu1 %v313_v15 }
  0xb5   :  { %v267_v20 = vpop.f32.mrf.mxu0  ;;  %v311_v21 = vmax.f32 %v305_v18, 0.0  ;;  %v280_v22 = vpop.f32.mrf.mxu1 }
  0xb6   :  { %v314_v23 = vpack.c.bf16 %v310_v19, %v310_v19 }
  0xb7   :  { %v315_v24 = vpack.c.bf16 %v311_v21, %v311_v21 }
  0xb8   :  { %610 = vmatmul.bf16.vlgmr.msrb.gmra.mxu2 %v314_v23 }
  0xb9   :  { %623 = vmatmul.bf16.vlgmr.msrb.gmra.mxu3 %v315_v24  ;;  %v293_v25 = vpop.f32.mrf.mxu2 }
  0xba   :  { %v306_v26 = vpop.f32.mrf.mxu3 }
 0x131   :  { %v585_v28 = vpop.f32.mrf.mxu0  ;;  %v598_v29 = vpop.f32.mrf.mxu1 }
 0x132   :  { %v586_v30 = vadd.f32 %v961_v27, %v585_v28 }
 0x134   :  { %v599_v31 = vadd.f32 %v598_v29, %v586_v30 }
 0x139   :  { %v587_v32 = vpop.f32.mrf.mxu0  ;;  %v600_v33 = vpop.f32.mrf.mxu1 }
 0x13b   :  { %v611_v34 = vpop.f32.mrf.mxu2 }
 0x13c   :  { %v612_v35 = vadd.f32 %v611_v34, %v599_v31  ;;  %v624_v36 = vpop.f32.mrf.mxu3 }
 0x13e   :  { %v625_v37 = vadd.f32 %v624_v36, %v612_v35 }
 0x140   :  { %628 = vst [vmem:[%s1073_s5] sm:$0xff] %v625_v37 }
 0x143   :  { %v613_v38 = vpop.f32.mrf.mxu2 }
 0x144   :  { %v626_v39 = vpop.f32.mrf.mxu3 }
 0x145   :  { %633 = vsyncpa [#allocation3], 1 }
 0x146   :  { %634 = vsyncpa [#allocation5], 1 }

</bundles_post_ra>
